<compile_context>
chip_gen: v7x
topology: tpu7x:2x2x1
jax: 0.10.0
libtpu: 0.0.40
codegen_flags: <defaults>
</compile_context>

<pallas_src>
from functools import partial

import jax
import jax.numpy as jnp
from jax.experimental import pallas as pl
from jax.experimental.pallas import tpu as pltpu


def _round_up(x, m):
    return (x + m - 1) // m * m


# ---------------------------------------------------------------------------
# Kernel
# ---------------------------------------------------------------------------
def critic_kernel(sa_ref, w1_ref, w2s_ref, w2a_ref, w3_ref, b1_ref, b2_ref,
                  out_ref):
    f32 = jnp.float32
    bf16 = jnp.bfloat16

    sa = sa_ref[...]               # (tb, SA_pad) f32  (state | action | 0-pad)
    sa_bf = sa.astype(bf16)        # MXU operand

    # fcs1 + ReLU.  w1 has zero rows for the action / pad columns of `sa`,
    # so this is exactly state @ w1.  bf16 x bf16 MXU, f32 accumulation,
    # explicit f32 bias add on the VPU.
    xs = jnp.maximum(
        jnp.dot(sa_bf, w1_ref[...], preferred_element_type=f32) + b1_ref[...],
        0.0)

    # fc2 over concat(xs, action) expressed as split matmuls over the merged
    # input (w2a has zero rows except the action rows) + f32 bias + ReLU.
    # b2 also sets a 1.0 "bias channel" in the last padded column of h2.
    h2 = (jnp.dot(xs.astype(bf16), w2s_ref[...], preferred_element_type=f32)
          + jnp.dot(sa_bf, w2a_ref[...], preferred_element_type=f32)
          + b2_ref[...])
    h2 = jnp.maximum(h2, 0.0)

    # fc3: single output unit -> VPU multiply by the (1, H2p) w3 row and an
    # XLU lane reduction; fc3's bias is carried by the h2 bias channel.
    # Narrow (tb, 1) store instead of a 128-lane-padded matmul + slab.
    out_ref[...] = jnp.sum(h2 * w3_ref[...], axis=-1, keepdims=True)


# ---------------------------------------------------------------------------
# Wrapper
# ---------------------------------------------------------------------------
@partial(jax.jit, static_argnames=("block_b",))
def critic_forward(state, action, params, *, block_b=512):
    """state: (B, S) f32, action: (B, A) f32 -> (B, 1) f32."""
    W1, W2s, W2a, W3row, B1, B2 = params
    B, S = state.shape
    A = action.shape[1]
    SA_pad, H1p = W1.shape
    H2p = W2s.shape[1]

    # Single merged, lane-aligned input operand (one DMA stream); the concat /
    # pad is fused into this jit alongside the pallas_call.
    sa = jnp.concatenate(
        [state.astype(jnp.float32),
         action.astype(jnp.float32),
         jnp.zeros((B, SA_pad - S - A), jnp.float32)],
        axis=1)

    # Batch tiling: at least two tiles whenever B allows (v7x has 2 TCs and
    # the axis is "parallel"), tile capped at block_b, rows multiple of 8.
    tb = min(block_b, max(8, _round_up(-(-B // 2), 8)))
    B_pad = _round_up(B, tb)
    if B_pad != B:
        sa = jnp.pad(sa, ((0, B_pad - B), (0, 0)))
    grid = (B_pad // tb,)

    # Advisory cost estimate so XLA schedules around this small kernel.
    flops = 2 * B_pad * (SA_pad * H1p + H1p * H2p + SA_pad * H2p) + 3 * B_pad * H2p
    bytes_accessed = (sa.size * 4
                      + (W1.size + W2s.size + W2a.size) * 2
                      + (W3row.size + B1.size + B2.size) * 4
                      + B_pad * 4)
    cost = pl.CostEstimate(flops=flops, transcendentals=0,
                           bytes_accessed=bytes_accessed)

    resident = dict(pipeline_mode=pl.Buffered(1))   # constant-index operands

    out = pl.pallas_call(
        critic_kernel,
        out_shape=jax.ShapeDtypeStruct((B_pad, 1), jnp.float32),
        grid_spec=pltpu.PrefetchScalarGridSpec(
            num_scalar_prefetch=0,
            grid=grid,
            in_specs=[
                pl.BlockSpec((tb, SA_pad), lambda i: (i, 0)),             # merged input (tiled)
                pl.BlockSpec((SA_pad, H1p), lambda i: (0, 0), **resident),  # W1   (bf16, resident)
                pl.BlockSpec((H1p, H2p), lambda i: (0, 0), **resident),     # W2 state block (bf16)
                pl.BlockSpec((SA_pad, H2p), lambda i: (0, 0), **resident),  # W2 action block (bf16)
                pl.BlockSpec((1, H2p), lambda i: (0, 0), **resident),       # w3 row (f32)
                pl.BlockSpec((1, H1p), lambda i: (0, 0), **resident),       # b1 (f32)
                pl.BlockSpec((1, H2p), lambda i: (0, 0), **resident),       # b2 (f32, + bias channel)
            ],
            out_specs=pl.BlockSpec((tb, 1), lambda i: (i, 0)),
        ),
        compiler_params=pltpu.CompilerParams(
            dimension_semantics=("parallel",)),
        cost_estimate=cost,
    )(sa, W1, W2s, W2a, W3row, B1, B2)

    return out[:B]


# ---------------------------------------------------------------------------
# Parameter construction (mirrors nn.Linear default init) + padding / packing
# ---------------------------------------------------------------------------
def init_critic_params(key, state_size, action_size,
                       fcs1_units=400, fc2_units=300):
    """Returns (master_params_f32, kernel_params)."""
    S, A, H1, H2 = state_size, action_size, fcs1_units, fc2_units
    ks = jax.random.split(key, 6)

    def linear(kw, kb, fan_in, fan_out):
        bound = fan_in ** -0.5
        w = jax.random.uniform(kw, (fan_in, fan_out), jnp.float32,
                               -bound, bound)          # stored (in, out)
        b = jax.random.uniform(kb, (fan_out,), jnp.float32, -bound, bound)
        return w, b

    w1, b1 = linear(ks[0], ks[1], S, H1)
    w2, b2 = linear(ks[2], ks[3], H1 + A, H2)
    w3, b3 = linear(ks[4], ks[5], H2, 1)
    master = (w1, b1, w2, b2, w3, b3)

    w2s, w2a = w2[:H1, :], w2[H1:, :]

    # Padded shapes.  The merged input is (state | action | zero-pad) of width
    # SA_pad; H2p reserves one extra column for the fc3 bias channel.
    SA_pad = _round_up(S + A, 8)
    H1p = _round_up(H1, 128)          # 400 -> 512
    H2p = _round_up(H2 + 1, 128)      # 300 (+1 bias channel) -> 384

    # fc1 weight over the merged input: only the state rows are non-zero.
    W1 = jnp.zeros((SA_pad, H1p), jnp.float32).at[:S, :H1].set(w1)
    # fc2 weight, xs block.
    W2s = jnp.zeros((H1p, H2p), jnp.float32).at[:H1, :H2].set(w2s)
    # fc2 weight, action block over the merged input: only the action rows.
    W2a = jnp.zeros((SA_pad, H2p), jnp.float32).at[S:S + A, :H2].set(w2a)

    # Biases stay f32 (tiny operands, VPU adds under MXU slack).
    B1 = jnp.zeros((1, H1p), jnp.float32).at[0, :H1].set(b1)
    B2 = (jnp.zeros((1, H2p), jnp.float32)
          .at[0, :H2].set(b2)
          .at[0, H2p - 1].set(1.0))           # 1.0 bias channel for fc3
    # fc3 as a single row; its bias rides the h2 bias channel.
    W3row = (jnp.zeros((1, H2p), jnp.float32)
             .at[0, :H2].set(w3[:, 0])
             .at[0, H2p - 1].set(b3[0]))

    kernel_params = (W1.astype(jnp.bfloat16), W2s.astype(jnp.bfloat16),
                     W2a.astype(jnp.bfloat16), W3row, B1, B2)
    return master, kernel_params


# ---------------------------------------------------------------------------
# References
# ---------------------------------------------------------------------------
def critic_reference_quantized(state, action, params):
    """Same padded / bf16-quantized math as the kernel, in plain JAX."""
    W1, W2s, W2a, W3row, B1, B2 = params
    B, S = state.shape
    A = action.shape[1]
    SA_pad = W1.shape[0]
    f32, bf16 = jnp.float32, jnp.bfloat16
    sa = jnp.concatenate(
        [state.astype(f32), action.astype(f32),
         jnp.zeros((B, SA_pad - S - A), f32)], axis=1)
    sa_bf = sa.astype(bf16)
    xs = jnp.maximum(jnp.dot(sa_bf, W1, preferred_element_type=f32) + B1, 0.0)
    h2 = jnp.maximum(
        jnp.dot(xs.astype(bf16), W2s, preferred_element_type=f32)
        + jnp.dot(sa_bf, W2a, preferred_element_type=f32) + B2, 0.0)
    return jnp.sum(h2 * W3row, axis=-1, keepdims=True)


def critic_reference_fp32(state, action, master):
    """Original (unpadded, unquantized) module semantics."""
    w1, b1, w2, b2, w3, b3 = master
    xs = jnp.maximum(state @ w1 + b1, 0.0)
    x = jnp.concatenate([xs, action], axis=1)
    h2 = jnp.maximum(x @ w2 + b2, 0.0)
    return h2 @ w3 + b3


# ---------------------------------------------------------------------------
if __name__ == "__main__":
    key = jax.random.PRNGKey(0)
    k_param, k_state, k_action = jax.random.split(key, 3)

    batch = 8
    state_size = 33
    action_size = 4

    master, params = init_critic_params(k_param, state_size, action_size,
                                        fcs1_units=400, fc2_units=300)
    state = jax.random.normal(k_state, (batch, state_size), jnp.float32)
    action = jax.random.normal(k_action, (batch, action_size), jnp.float32)

    out = critic_forward(state, action, params)
    out = jax.block_until_ready(out)
    assert out.shape == (batch, 1), out.shape

    # Strict check: kernel vs. identical (bf16-quantized, padded) math.
    ref_q = critic_reference_quantized(state, action, params)
    err_q = float(jnp.max(jnp.abs(out - ref_q)))
    assert jnp.allclose(out, ref_q, atol=2e-3, rtol=2e-3), (
        f"kernel vs quantized ref max abs err {err_q}")

    # Loose check: kernel vs. the original f32 module semantics (difference is
    # only the bf16 quantization of weights and matmul operands).
    ref_f = critic_reference_fp32(state, action, master)
    err_f = float(jnp.max(jnp.abs(out - ref_f)))
    assert jnp.allclose(out, ref_f, atol=5e-2, rtol=5e-2), (
        f"kernel vs fp32 ref max abs err {err_f}")

    print("KERNEL_OK")
</pallas_src>

<mosaic_0001>
module attributes {stable_mosaic.version = 11 : i64} {
  func.func @critic_kernel(%arg0: i32, %arg1: memref<8x40xf32, #tpu.memory_space<vmem>>, %arg2: memref<40x512xbf16, #tpu.memory_space<vmem>>, %arg3: memref<512x384xbf16, #tpu.memory_space<vmem>>, %arg4: memref<40x384xbf16, #tpu.memory_space<vmem>>, %arg5: memref<1x384xf32, #tpu.memory_space<vmem>>, %arg6: memref<1x512xf32, #tpu.memory_space<vmem>>, %arg7: memref<1x384xf32, #tpu.memory_space<vmem>>, %arg8: memref<8x1xf32, #tpu.memory_space<vmem>>) attributes {dimension_semantics = [#tpu.dimension_semantics<parallel>], iteration_bounds = array<i64: 1>, scalar_prefetch = 0 : i64, scratch_operands = 0 : i64, tpu.core_type = #tpu.core_type<tc>, window_params = [{transform_indices = @transform_0, window_bounds = array<i64: 8, 40>}, {pipeline_mode = #tpu.pipeline_mode<synchronous>, transform_indices = @transform_1, window_bounds = array<i64: 40, 512>}, {pipeline_mode = #tpu.pipeline_mode<synchronous>, transform_indices = @transform_2, window_bounds = array<i64: 512, 384>}, {pipeline_mode = #tpu.pipeline_mode<synchronous>, transform_indices = @transform_3, window_bounds = array<i64: 40, 384>}, {pipeline_mode = #tpu.pipeline_mode<synchronous>, transform_indices = @transform_4, window_bounds = array<i64: 1, 384>}, {pipeline_mode = #tpu.pipeline_mode<synchronous>, transform_indices = @transform_5, window_bounds = array<i64: 1, 512>}, {pipeline_mode = #tpu.pipeline_mode<synchronous>, transform_indices = @transform_6, window_bounds = array<i64: 1, 384>}, {transform_indices = @transform_7, window_bounds = array<i64: 8, 1>}]} {
    %c0 = arith.constant 0 : index
    %c0_0 = arith.constant 0 : index
    %0 = vector.load %arg1[%c0, %c0_0] : memref<8x40xf32, #tpu.memory_space<vmem>>, vector<8x40xf32>
    %1 = arith.truncf %0 : vector<8x40xf32> to vector<8x40xbf16>
    %c0_1 = arith.constant 0 : index
    %c0_2 = arith.constant 0 : index
    %2 = vector.load %arg2[%c0_1, %c0_2] : memref<40x512xbf16, #tpu.memory_space<vmem>>, vector<40x512xbf16>
    %cst = arith.constant dense<0.000000e+00> : vector<8x512xf32>
    %3 = tpu.matmul %1, %2, %cst {dimension_numbers = #tpu.dot_dimension_numbers<[1], [0], [0], [1], [0, 0, 1, 1], [], []>} : vector<8x40xbf16>, vector<40x512xbf16>, vector<8x512xf32> -> vector<8x512xf32>
    %c0_3 = arith.constant 0 : index
    %c0_4 = arith.constant 0 : index
    %4 = vector.load %arg6[%c0_3, %c0_4] : memref<1x512xf32, #tpu.memory_space<vmem>>, vector<1x512xf32>
    %5 = vector.broadcast %4 : vector<1x512xf32> to vector<8x512xf32>
    %6 = arith.addf %3, %5 : vector<8x512xf32>
    %cst_5 = arith.constant 0.000000e+00 : f32
    %7 = vector.broadcast %cst_5 : f32 to vector<8x512xf32>
    %8 = arith.maximumf %6, %7 : vector<8x512xf32>
    %9 = arith.truncf %8 : vector<8x512xf32> to vector<8x512xbf16>
    %c0_6 = arith.constant 0 : index
    %c0_7 = arith.constant 0 : index
    %10 = vector.load %arg3[%c0_6, %c0_7] : memref<512x384xbf16, #tpu.memory_space<vmem>>, vector<512x384xbf16>
    %cst_8 = arith.constant dense<0.000000e+00> : vector<8x384xf32>
    %11 = tpu.matmul %9, %10, %cst_8 {dimension_numbers = #tpu.dot_dimension_numbers<[1], [0], [0], [1], [0, 0, 1, 1], [], []>} : vector<8x512xbf16>, vector<512x384xbf16>, vector<8x384xf32> -> vector<8x384xf32>
    %c0_9 = arith.constant 0 : index
    %c0_10 = arith.constant 0 : index
    %12 = vector.load %arg4[%c0_9, %c0_10] : memref<40x384xbf16, #tpu.memory_space<vmem>>, vector<40x384xbf16>
    %cst_11 = arith.constant dense<0.000000e+00> : vector<8x384xf32>
    %13 = tpu.matmul %1, %12, %cst_11 {dimension_numbers = #tpu.dot_dimension_numbers<[1], [0], [0], [1], [0, 0, 1, 1], [], []>} : vector<8x40xbf16>, vector<40x384xbf16>, vector<8x384xf32> -> vector<8x384xf32>
    %14 = arith.addf %11, %13 : vector<8x384xf32>
    %c0_12 = arith.constant 0 : index
    %c0_13 = arith.constant 0 : index
    %15 = vector.load %arg7[%c0_12, %c0_13] : memref<1x384xf32, #tpu.memory_space<vmem>>, vector<1x384xf32>
    %16 = vector.broadcast %15 : vector<1x384xf32> to vector<8x384xf32>
    %17 = arith.addf %14, %16 : vector<8x384xf32>
    %cst_14 = arith.constant 0.000000e+00 : f32
    %18 = vector.broadcast %cst_14 : f32 to vector<8x384xf32>
    %19 = arith.maximumf %17, %18 : vector<8x384xf32>
    %c0_15 = arith.constant 0 : index
    %c0_16 = arith.constant 0 : index
    %20 = vector.load %arg5[%c0_15, %c0_16] : memref<1x384xf32, #tpu.memory_space<vmem>>, vector<1x384xf32>
    %21 = vector.broadcast %20 : vector<1x384xf32> to vector<8x384xf32>
    %22 = arith.mulf %19, %21 : vector<8x384xf32>
    %cst_17 = arith.constant dense<0.000000e+00> : vector<8xf32>
    %23 = vector.multi_reduction <add>, %22, %cst_17 [1] : vector<8x384xf32> to vector<8xf32>
    %24 = vector.shape_cast %23 : vector<8xf32> to vector<8x1xf32>
    %c0_18 = arith.constant 0 : index
    %c0_19 = arith.constant 0 : index
    %25 = vector.load %arg8[%c0_18, %c0_19] : memref<8x1xf32, #tpu.memory_space<vmem>>, vector<8x1xf32>
    tpu.vector_store %arg8[%c0_18, %c0_19], %24 {strides = array<i32>} : memref<8x1xf32, #tpu.memory_space<vmem>>, vector<8x1xf32>,
    return
  }
  func.func @transform_0(%arg0: i32) -> (i32, i32) {
    %c0_i32 = arith.constant 0 : i32
    %c0_i32_0 = arith.constant 0 : i32
    return %arg0, %c0_i32 : i32, i32
  }
  func.func @transform_1(%arg0: i32) -> (i32, i32) {
    %c0_i32 = arith.constant 0 : i32
    %c0_i32_0 = arith.constant 0 : i32
    %c0_i32_1 = arith.constant 0 : i32
    return %c0_i32, %c0_i32_0 : i32, i32
  }
  func.func @transform_2(%arg0: i32) -> (i32, i32) {
    %c0_i32 = arith.constant 0 : i32
    %c0_i32_0 = arith.constant 0 : i32
    %c0_i32_1 = arith.constant 0 : i32
    return %c0_i32, %c0_i32_0 : i32, i32
  }
  func.func @transform_3(%arg0: i32) -> (i32, i32) {
    %c0_i32 = arith.constant 0 : i32
    %c0_i32_0 = arith.constant 0 : i32
    %c0_i32_1 = arith.constant 0 : i32
    return %c0_i32, %c0_i32_0 : i32, i32
  }
  func.func @transform_4(%arg0: i32) -> (i32, i32) {
    %c0_i32 = arith.constant 0 : i32
    %c0_i32_0 = arith.constant 0 : i32
    %c0_i32_1 = arith.constant 0 : i32
    return %c0_i32, %c0_i32_0 : i32, i32
  }
  func.func @transform_5(%arg0: i32) -> (i32, i32) {
    %c0_i32 = arith.constant 0 : i32
    %c0_i32_0 = arith.constant 0 : i32
    %c0_i32_1 = arith.constant 0 : i32
    return %c0_i32, %c0_i32_0 : i32, i32
  }
  func.func @transform_6(%arg0: i32) -> (i32, i32) {
    %c0_i32 = arith.constant 0 : i32
    %c0_i32_0 = arith.constant 0 : i32
    %c0_i32_1 = arith.constant 0 : i32
    return %c0_i32, %c0_i32_0 : i32, i32
  }
  func.func @transform_7(%arg0: i32) -> (i32, i32) {
    %c0_i32 = arith.constant 0 : i32
    %c0_i32_0 = arith.constant 0 : i32
    return %arg0, %c0_i32 : i32, i32
  }
}

</mosaic_0001>

<bundles_post_ra>
// kernel: critic_forward.1
= control target key start
LH: loop header
LB: loop body
LE: loop exit
PB: predicated region body
PF: predicated region fallthrough
CT: control target
= control target key end

     0   :  { %12 = vsyncpa [#allocation3], 0  ;;  %s1820_s0 = inlined_call_operand.vmem [shape: f32[8,40], index: 0, kind: input, shape index: {}]   ;;  %s1821_s1 = inlined_call_operand.hbm [shape: bf16[40,512], index: 1, kind: input, shape index: {}]   ;;  %s1822_s2 = inlined_call_operand.hbm [shape: bf16[512,384], index: 2, kind: input, shape index: {}]   ;;  %s1823_s3 = inlined_call_operand.hbm [shape: bf16[40,384], index: 3, kind: input, shape index: {}]   ;;  %s1824_s4 = inlined_call_operand.vmem [shape: f32[1,384], index: 4, kind: input, shape index: {}]   ;;  %s1825_s5 = inlined_call_operand.vmem [shape: f32[1,512], index: 5, kind: input, shape index: {}]   ;;  %s1826_s6 = inlined_call_operand.vmem [shape: f32[1,384], index: 6, kind: input, shape index: {}]   ;;  %s1827_s7 = inlined_call_operand.vmem [shape: f32[8,1], index: 7, kind: output, shape index: {}]  }
   0x1   :  { %13 = vsyncpa [#allocation5], 0  ;;  %s1673_s24 = smov [#allocation4]   ;;  %s1603_s28 = scalar_lea.hbm %s1822_s2, 12288 }
   0x2   :  { %s33_s25 = sshll.u32 %s1673_s24, 4  ;;  %p1604_p0 = scmp.ne.s32.totalorder %s1822_s2, %s1603_s28  ;;  %s34_s25 = int_to_ptr.vmem [resolvable:$true] %s33_s25 }
   0x3   :  { %p1607_p1 = scmp.lt.u32.totalorder %s1603_s28, %s1822_s2 }
   0x5   :  { %p1609_p2 = pnand %p1607_p1, %p1604_p0 }
   0x7   :  { %1612 = shalt.err (!%p1609_p2)
}
   0x8   :  { %s1613_s10 = scalar_lea.vmem %s34_s25, 12288  ;;  %p1618_p4 = scmp.lt.s32.totalorder %s34_s25, %s34_s25 }
   0x9   :  { %p1614_p3 = scmp.ne.s32.totalorder %s34_s25, %s1613_s10  ;;  %p1619_p5 = scmp.lt.s32.totalorder %s1613_s10, %s1613_s10 }
   0xb   :  { %p1620_p6 = por %p1619_p5, %p1618_p4 }
   0xd   :  { %p1621_p7 = pnand %p1620_p6, %p1614_p3 }
   0xf   :  { %1624 = shalt.err (!%p1621_p7)
}
  0x10   :  { %s1674_s11 = smov 192   ;;  %s1675_s12 = smov 12  }
  0x11   :  { %39 = dma.hbm_to_vmem [thread:$0]  %s1822_s2, 12288, %s34_s25, [#allocation5], %s1674_s11, %s1674_s11, %s1675_s12  }
  0x12   :  { %s1676_s15 = smov [#allocation2]   ;;  %s1625_s19 = scalar_lea.hbm %s1821_s1, 1280 }
  0x13   :  { %s21_s16 = sshll.u32 %s1676_s15, 4  ;;  %p1626_p8 = scmp.ne.s32.totalorder %s1821_s1, %s1625_s19  ;;  %s22_s16 = int_to_ptr.vmem [resolvable:$true] %s21_s16 }
  0x14   :  { %p1629_p9 = scmp.lt.u32.totalorder %s1625_s19, %s1821_s1 }
  0x16   :  { %p1631_p10 = pnand %p1629_p9, %p1626_p8 }
  0x18   :  { %1634 = shalt.err (!%p1631_p10)
}
  0x19   :  { %s1635_s24 = scalar_lea.vmem %s22_s16, 1280  ;;  %p1640_p12 = scmp.lt.s32.totalorder %s22_s16, %s22_s16 }
  0x1a   :  { %p1636_p11 = scmp.ne.s32.totalorder %s22_s16, %s1635_s24  ;;  %p1641_p13 = scmp.lt.s32.totalorder %s1635_s24, %s1635_s24 }
  0x1c   :  { %p1642_p0 = por %p1641_p13, %p1640_p12 }
  0x1e   :  { %p1643_p1 = pnand %p1642_p0, %p1636_p11 }
  0x20   :  { %1646 = shalt.err (!%p1643_p1)
}
  0x21   :  { %s1677_s2 = smov 256   ;;  %s1678_s25 = smov 16  }
  0x22   :  { %27 = dma.hbm_to_vmem [thread:$0]  %s1821_s1, 1280, %s22_s16, [#allocation3], %s1677_s2, %s1677_s2, %s1678_s25  }
  0x23   :  { %s1679_s28 = smov [#allocation6]   ;;  %s1647_s9 = scalar_lea.hbm %s1823_s3, 960 }
  0x24   :  { %s45_s29 = sshll.u32 %s1679_s28, 4  ;;  %p1648_p2 = scmp.ne.s32.totalorder %s1823_s3, %s1647_s9  ;;  %s46_s29 = int_to_ptr.vmem [resolvable:$true] %s45_s29 }
  0x25   :  { %p1651_p3 = scmp.lt.u32.totalorder %s1647_s9, %s1823_s3 }
  0x27   :  { %p1653_p4 = pnand %p1651_p3, %p1648_p2 }
  0x29   :  { %1656 = shalt.err (!%p1653_p4)
}
  0x2a   :  { %s1657_s17 = scalar_lea.vmem %s46_s29, 960  ;;  %p1662_p6 = scmp.lt.s32.totalorder %s46_s29, %s46_s29 }
  0x2b   :  { %p1658_p5 = scmp.ne.s32.totalorder %s46_s29, %s1657_s17  ;;  %p1663_p7 = scmp.lt.s32.totalorder %s1657_s17, %s1657_s17 }
  0x2d   :  { %p1664_p8 = por %p1663_p7, %p1662_p6 }
  0x2f   :  { %p1665_p9 = pnand %p1664_p8, %p1658_p5 }
  0x31   :  { %1668 = shalt.err (!%p1665_p9)
}
  0x32   :  { %51 = dma.hbm_to_vmem [thread:$0]  %s1823_s3, 960, %s46_s29, [#allocation5], %s1674_s11, %s1674_s11, %s1675_s12  }
  0x33   :  { %1669 = dma.done.wait [#allocation3], 1280  }
  0x34   :  { %1670 = vsyncadd [#allocation3], 4294966016 }
  0x35   :  { %1671 = dma.done.wait [#allocation5], 13248  }
  0x36   :  { %1672 = vsyncadd [#allocation5], 4294954048  ;;  %v1680_v0 = vmov 0   ;;  %v1448_v1 = vld [vmem:[#allocation2 + $0x4] ss:$16 sps:$4 sm:$0xff]   ;;  %vm156_vm0 = vcmask 1043456  }
  0x37   :  { %201 = vmatprep.mubr.bf16.mxu0 %v1680_v0  ;;  %242 = vmatprep.mubr.bf16.mxu1 %v1680_v0  ;;  %v1450_v2 = vld [vmem:[#allocation2 + $0xc] ss:$16 sps:$4 sm:$0xff]   ;;  %v1452_v3 = vld [vmem:[#allocation2] ss:$16 sps:$4 sm:$0xff]   ;;  %v1453_v4 = vld [vmem:[#allocation2 + $0x8] ss:$16 sps:$4 sm:$0xff]  }
  0x38   :  { %169 = vmatprep.subr.bf16.mxu0 %v1448_v1  ;;  %210 = vmatprep.subr.bf16.mxu1 %v1450_v2  ;;  %v1454_v5 = vld [vmem:[#allocation2 + $0x24] ss:$16 sps:$4 sm:$0xff]   ;;  %v1456_v6 = vld [vmem:[#allocation2 + $0x2c] ss:$16 sps:$4 sm:$0xff]   ;;  %v1458_v7 = vld [vmem:[#allocation2 + $0x20] ss:$16 sps:$4 sm:$0xff]  }
  0x39   :  { %170 = vmatpush1.bf16.msra.mxu0 %v1452_v3  ;;  %211 = vmatpush1.bf16.msra.mxu1 %v1453_v4  ;;  %v1459_v8 = vld [vmem:[#allocation2 + $0x28] ss:$16 sps:$4 sm:$0xff]   ;;  %v78_v9 = vld [vmem:[#allocation2 + $0x40] sm:$0xff]  ;;  %v1464_v20 = vld [vmem:[#allocation6] ss:$12 sps:$4 sm:$0xff]   ;;  %vm152_vm1 = vcmask 326656  }
  0x3a   :  { %171 = vmatprep.subr.bf16.mxu0 %v1454_v5  ;;  %v79_v10 = vld [vmem:[#allocation2 + $0x48] sm:$0xff]  ;;  %212 = vmatprep.subr.bf16.mxu1 %v1456_v6  ;;  %v1265_v11 = vcombine.high %v78_v9, %v78_v9  ;;  %v1264_v13 = vcombine.low %v78_v9, %v78_v9  ;;  %v68_v15 = vld [vmem:[%s1820_s0] sm:$0xff]  ;;  %v1681_v22 = vmov 0.0   ;;  %v1471_v26 = vld [vmem:[#allocation6 + $0x20] ss:$12 sps:$4 sm:$0xff]   ;;  %vm1682_vm2 = vmmov 0  }
  0x3b   :  { %v1267_v12 = vcombine.high %v79_v10, %v79_v10  ;;  %v1266_v14 = vcombine.low %v79_v10, %v79_v10  ;;  %v1466_v18 = vld [vmem:[#allocation6 + $0x4] ss:$12 sps:$4 sm:$0xff]   ;;  %v69_v19 = vpack.c.bf16 %v68_v15, %v68_v15  ;;  %v1467_v21 = vld [vmem:[#allocation6 + $0x8] ss:$12 sps:$4 sm:$0xff]   ;;  %v1474_v29 = vld [vmem:[#allocation6 + $0x38] ss:$0 sps:$4 sm:$0xff]  }
  0x3c   :  { %v158_v16 = vsel %vm156_vm0, %v1264_v13, 0  ;;  %v1470_v23 = vld [vmem:[#allocation6 + $0x1c] ss:$12 sps:$4 sm:$0xff]   ;;  %v395_v24 = vld [vmem:[#allocation6 + $0x30] sm:$0xff]  ;;  %v1468_v25 = vld [vmem:[#allocation6 + $0x18] ss:$12 sps:$4 sm:$0xff]  }
  0x3d   :  { %172 = vmatpush1.bf16.msra.mxu0 %v1458_v7  ;;  %213 = vmatpush1.bf16.msra.mxu1 %v1459_v8  ;;  %v164_v17 = vsel %vm156_vm0, %v1266_v14, 0  ;;  %v1279_v27 = vcombine.high %v395_v24, %v395_v24  ;;  %v1278_v28 = vcombine.low %v395_v24, %v395_v24  ;;  %v1477_v30 = vld [vmem:[#allocation4 + $0x4] ss:$12 sps:$4 sm:$0xff]   ;;  %v444_v32 = vsel %vm156_vm0, %v1474_v29, 0  ;;  %v1475_v34 = vld [vmem:[#allocation4] ss:$12 sps:$4 sm:$0xff]  }
  0x3e   :  { %1268 = vmatprep.subr.msk.bf16.mxu0 %vm156_vm0, %v1265_v11  ;;  %1270 = vmatprep.subr.msk.bf16.mxu1 %vm156_vm0, %v1267_v12  ;;  %v1480_v33 = vld [vmem:[#allocation4 + $0x184] ss:$12 sps:$4 sm:$0xff]   ;;  %v1478_v35 = vld [vmem:[#allocation4 + $0x180] ss:$12 sps:$4 sm:$0xff]   ;;  %v1483_v36 = vld [vmem:[#allocation4 + $0x1c] ss:$12 sps:$4 sm:$0xff]  }
  0x3f   :  { %v438_v31 = vsel %vm156_vm0, %v1278_v28, 0  ;;  %v1486_v37 = vld [vmem:[#allocation4 + $0x19c] ss:$12 sps:$4 sm:$0xff]   ;;  %v1481_v38 = vld [vmem:[#allocation4 + $0x18] ss:$12 sps:$4 sm:$0xff]   ;;  %vm1248_vm3 = vcmask 7168  }
  0x40   :  { %v1484_v39 = vld [vmem:[#allocation4 + $0x198] ss:$12 sps:$4 sm:$0xff]   ;;  %v1489_v40 = vld [vmem:[#allocation4 + $0x34] ss:$12 sps:$4 sm:$0xff]   ;;  %v1487_v42 = vld [vmem:[#allocation4 + $0x30] ss:$12 sps:$4 sm:$0xff]  }
  0x41   :  { %174 = vmatpush1.bf16.msra.mxu0 %v158_v16  ;;  %215 = vmatpush1.bf16.msra.mxu1 %v164_v17  ;;  %v1492_v41 = vld [vmem:[#allocation4 + $0x1b4] ss:$12 sps:$4 sm:$0xff]   ;;  %v1490_v43 = vld [vmem:[#allocation4 + $0x1b0] ss:$12 sps:$4 sm:$0xff]   ;;  %v1495_v44 = vld [vmem:[#allocation4 + $0x4c] ss:$12 sps:$4 sm:$0xff]  }
  0x42   :  { %446 = vmatprep.subr.bf16.mxu0 %v1466_v18  ;;  %1428 = vmatprep.subr.bf16.mxu1 %v1681_v22  ;;  %v1498_v45 = vld [vmem:[#allocation4 + $0x1cc] ss:$12 sps:$4 sm:$0xff]   ;;  %v1493_v46 = vld [vmem:[#allocation4 + $0x48] ss:$12 sps:$4 sm:$0xff]   ;;  %v1501_v48 = vld [vmem:[#allocation4 + $0x64] ss:$12 sps:$4 sm:$0xff]  }
  0x43   :  { %v1496_v47 = vld [vmem:[#allocation4 + $0x1c8] ss:$12 sps:$4 sm:$0xff]   ;;  %v1504_v49 = vld [vmem:[#allocation4 + $0x1e4] ss:$12 sps:$4 sm:$0xff]   ;;  %v1499_v50 = vld [vmem:[#allocation4 + $0x60] ss:$12 sps:$4 sm:$0xff]  }
  0x44   :  { %1269 = vmatmul.mubr.msk.bf16.vlgmr.msra.gmra.mrb[0].mxu0 %vm152_vm1, %v69_v19  ;;  %1271 = vmatmul.mubr.msk.bf16.vlgmr.msra.gmra.mrb[0].mxu1 %vm152_vm1, %v69_v19  ;;  %v1502_v51 = vld [vmem:[#allocation4 + $0x1e0] ss:$12 sps:$4 sm:$0xff]   ;;  %v1507_v52 = vld [vmem:[#allocation4 + $0x7c] ss:$12 sps:$4 sm:$0xff]   ;;  %v1505_v54 = vld [vmem:[#allocation4 + $0x78] ss:$12 sps:$4 sm:$0xff]  }
  0x45   :  { %447 = vmatpush1.bf16.msra.mxu0 %v1464_v20  ;;  %1429 = vmatpush3.bf16.msra.mxu1 %v1467_v21  ;;  %v1510_v53 = vld [vmem:[#allocation4 + $0x1fc] ss:$12 sps:$4 sm:$0xff]   ;;  %v1508_v55 = vld [vmem:[#allocation4 + $0x1f8] ss:$12 sps:$4 sm:$0xff]   ;;  %v1513_v56 = vld [vmem:[#allocation4 + $0x94] ss:$12 sps:$4 sm:$0xff]  }
  0x46   :  { %448 = vmatprep.subr.bf16.mxu0 %v1470_v23  ;;  %1430 = vmatprep.subr.bf16.mxu1 %v1681_v22  ;;  %v1516_v57 = vld [vmem:[#allocation4 + $0x214] ss:$12 sps:$4 sm:$0xff]   ;;  %v1511_v58 = vld [vmem:[#allocation4 + $0x90] ss:$12 sps:$4 sm:$0xff]   ;;  %v1519_v60 = vld [vmem:[#allocation4 + $0xac] ss:$12 sps:$4 sm:$0xff]  }
  0x47   :  { %478 = vmatprep.mubr.bf16.mxu0 %v1680_v0  ;;  %1434 = vmatprep.mubr.msk.bf16.mxu1 %vm1682_vm2, %v1681_v22  ;;  %v1514_v59 = vld [vmem:[#allocation4 + $0x210] ss:$12 sps:$4 sm:$0xff]   ;;  %v1522_v61 = vld [vmem:[#allocation4 + $0x22c] ss:$12 sps:$4 sm:$0xff]   ;;  %v1517_v62 = vld [vmem:[#allocation4 + $0xa8] ss:$12 sps:$4 sm:$0xff]  }
  0x48   :  { %v1520_v63 = vld [vmem:[#allocation4 + $0x228] ss:$12 sps:$4 sm:$0xff]   ;;  %v1525_v0 = vld [vmem:[#allocation4 + $0xc4] ss:$12 sps:$4 sm:$0xff]   ;;  %v1523_v2 = vld [vmem:[#allocation4 + $0xc0] ss:$12 sps:$4 sm:$0xff]  }
  0x49   :  { %449 = vmatpush1.bf16.msra.mxu0 %v1468_v25  ;;  %1431 = vmatpush3.bf16.msra.mxu1 %v1471_v26  ;;  %v1528_v1 = vld [vmem:[#allocation4 + $0x244] ss:$12 sps:$4 sm:$0xff]   ;;  %v1526_v3 = vld [vmem:[#allocation4 + $0x240] ss:$12 sps:$4 sm:$0xff]   ;;  %v1531_v4 = vld [vmem:[#allocation4 + $0xdc] ss:$12 sps:$4 sm:$0xff]  }
  0x4a   :  { %1281 = vmatprep.subr.msk.bf16.mxu0 %vm156_vm0, %v1279_v27  ;;  %1432 = vmatprep.subr.bf16.mxu1 %v1681_v22  ;;  %v1534_v5 = vld [vmem:[#allocation4 + $0x25c] ss:$12 sps:$4 sm:$0xff]   ;;  %v1529_v6 = vld [vmem:[#allocation4 + $0xd8] ss:$12 sps:$4 sm:$0xff]   ;;  %v1537_v8 = vld [vmem:[#allocation4 + $0xf4] ss:$12 sps:$4 sm:$0xff]  }
  0x4b   :  { %v1532_v7 = vld [vmem:[#allocation4 + $0x258] ss:$12 sps:$4 sm:$0xff]   ;;  %v1540_v9 = vld [vmem:[#allocation4 + $0x274] ss:$12 sps:$4 sm:$0xff]   ;;  %v1535_v10 = vld [vmem:[#allocation4 + $0xf0] ss:$12 sps:$4 sm:$0xff]  }
  0x4c   :  { %v1538_v11 = vld [vmem:[#allocation4 + $0x270] ss:$12 sps:$4 sm:$0xff]   ;;  %v1543_v12 = vld [vmem:[#allocation4 + $0x10c] ss:$12 sps:$4 sm:$0xff]   ;;  %v1541_v14 = vld [vmem:[#allocation4 + $0x108] ss:$12 sps:$4 sm:$0xff]  }
  0x4d   :  { %451 = vmatpush1.bf16.msra.mxu0 %v438_v31  ;;  %1433 = vmatpush3.bf16.msra.mxu1 %v444_v32  ;;  %v1546_v13 = vld [vmem:[#allocation4 + $0x28c] ss:$12 sps:$4 sm:$0xff]   ;;  %v1544_v15 = vld [vmem:[#allocation4 + $0x288] ss:$12 sps:$4 sm:$0xff]   ;;  %v1549_v16 = vld [vmem:[#allocation4 + $0x124] ss:$12 sps:$4 sm:$0xff]  }
  0x4e   :  { %1039 = vmatprep.subr.bf16.mxu0 %v1477_v30  ;;  %1080 = vmatprep.subr.bf16.mxu1 %v1480_v33  ;;  %v1552_v17 = vld [vmem:[#allocation4 + $0x2a4] ss:$12 sps:$4 sm:$0xff]   ;;  %v1547_v18 = vld [vmem:[#allocation4 + $0x120] ss:$12 sps:$4 sm:$0xff]   ;;  %v1555_v20 = vld [vmem:[#allocation4 + $0x13c] ss:$12 sps:$4 sm:$0xff]  }
  0x4f   :  { %v1558_v21 = vld [vmem:[#allocation4 + $0x2bc] ss:$12 sps:$4 sm:$0xff]   ;;  %v1553_v22 = vld [vmem:[#allocation4 + $0x138] ss:$12 sps:$4 sm:$0xff]   ;;  %v1561_v24 = vld [vmem:[#allocation4 + $0x154] ss:$12 sps:$4 sm:$0xff]  }
  0x50   :  { %1282 = vmatmul.mubr.msk.bf16.vlgmr.msra.gmra.mrb[4].mxu0 %vm152_vm1, %v69_v19  ;;  %1435 = vmatmul.mubr.msk.bf16.vlgmr.msra.gmra.mrb[4].mxu1 %vm152_vm1, %v69_v19  ;;  %v1550_v19 = vld [vmem:[#allocation4 + $0x2a0] ss:$12 sps:$4 sm:$0xff]   ;;  %v1556_v23 = vld [vmem:[#allocation4 + $0x2b8] ss:$12 sps:$4 sm:$0xff]   ;;  %v1559_v26 = vld [vmem:[#allocation4 + $0x150] ss:$12 sps:$4 sm:$0xff]  }
  0x51   :  { %1040 = vmatpush1.bf16.msra.mxu0 %v1475_v34  ;;  %1081 = vmatpush1.bf16.msra.mxu1 %v1478_v35  ;;  %v1564_v25 = vld [vmem:[#allocation4 + $0x2d4] ss:$12 sps:$4 sm:$0xff]   ;;  %v1562_v27 = vld [vmem:[#allocation4 + $0x2d0] ss:$12 sps:$4 sm:$0xff]   ;;  %v1567_v28 = vld [vmem:[#allocation4 + $0x16c] ss:$12 sps:$4 sm:$0xff]   ;;  %v82_v34 = vlaneseq }
  0x52   :  { %1041 = vmatprep.subr.bf16.mxu0 %v1483_v36  ;;  %1082 = vmatprep.subr.bf16.mxu1 %v1486_v37  ;;  %v1570_v29 = vld [vmem:[#allocation4 + $0x2ec] ss:$12 sps:$4 sm:$0xff]   ;;  %v1565_v30 = vld [vmem:[#allocation4 + $0x168] ss:$12 sps:$4 sm:$0xff]  }
  0x53   :  { %v1568_v31 = vld [vmem:[#allocation4 + $0x2e8] ss:$12 sps:$4 sm:$0xff]   ;;  %v83_v35 = vshrl.u32 %v82_v34, 7  ;;  %v1598_v34 = vld [vmem:[#allocation4 + $0x218] ss:$12 sps:$4 sm:$0xff]  }
  0x54   :  { %v1571_v32 = vld [vmem:[#allocation4 + $0xc8] ss:$12 sps:$4 sm:$0xff]  }
  0x55   :  { %1042 = vmatpush1.bf16.msra.mxu0 %v1481_v38  ;;  %1083 = vmatpush1.bf16.msra.mxu1 %v1484_v39  ;;  %v1572_v33 = vld [vmem:[#allocation4 + $0x248] ss:$12 sps:$4 sm:$0xff]   ;;  %v1779_v36 = vsub.s32 0, %v83_v35  ;;  %v1781_v37 = vsub.s32 2, %v83_v35  ;;  %v80_v38 = vld [vmem:[%s1825_s5] sm:$0xf] }
  0x56   :  { %1043 = vmatprep.subr.bf16.mxu0 %v1489_v40  ;;  %1084 = vmatprep.subr.bf16.mxu1 %v1492_v41  ;;  %v1786_v39 = vsub.s32 1, %v83_v35  ;;  %v96_v40 = vsub.s32 3, %v83_v35  ;;  %v1599_v35 = vld [vmem:[#allocation4 + $0x170] ss:$12 sps:$4 sm:$0xff]  }
  0x57   :  { %v85_v41 = vrot.slane %v80_v38, %v1779_v36 }
  0x59   :  { %1044 = vmatpush1.bf16.msra.mxu0 %v1487_v42  ;;  %1085 = vmatpush1.bf16.msra.mxu1 %v1490_v43  ;;  %v93_v42 = vrot.slane %v80_v38, %v1781_v37  ;;  %v89_v43 = vrot.slane %v80_v38, %v1786_v39 }
  0x5a   :  { %1045 = vmatprep.subr.bf16.mxu0 %v1495_v44  ;;  %1086 = vmatprep.subr.bf16.mxu1 %v1498_v45  ;;  %v97_v44 = vrot.slane %v80_v38, %v96_v40  ;;  %v1600_v38 = vld [vmem:[#allocation4 + $0x2f0] ss:$12 sps:$4 sm:$0xff]  }
  0x5b   :  { %v1601_v40 = vld [vmem:[#allocation4 + $0xb0] ss:$12 sps:$4 sm:$0xff]  }
  0x5d   :  { %1046 = vmatpush1.bf16.msra.mxu0 %v1493_v46  ;;  %1087 = vmatpush1.bf16.msra.mxu1 %v1496_v47 }
  0x5e   :  { %1047 = vmatprep.subr.bf16.mxu0 %v1501_v48  ;;  %1088 = vmatprep.subr.bf16.mxu1 %v1504_v49 }
  0x61   :  { %1048 = vmatpush1.bf16.msra.mxu0 %v1499_v50  ;;  %1089 = vmatpush1.bf16.msra.mxu1 %v1502_v51 }
  0x62   :  { %1049 = vmatprep.subr.bf16.mxu0 %v1507_v52  ;;  %1090 = vmatprep.subr.bf16.mxu1 %v1510_v53 }
  0x65   :  { %1050 = vmatpush1.bf16.msra.mxu0 %v1505_v54  ;;  %1091 = vmatpush1.bf16.msra.mxu1 %v1508_v55 }
  0x66   :  { %1051 = vmatprep.subr.bf16.mxu0 %v1513_v56  ;;  %1092 = vmatprep.subr.bf16.mxu1 %v1516_v57 }
  0x69   :  { %1052 = vmatpush1.bf16.msra.mxu0 %v1511_v58  ;;  %1093 = vmatpush1.bf16.msra.mxu1 %v1514_v59 }
  0x6a   :  { %1053 = vmatprep.subr.bf16.mxu0 %v1519_v60  ;;  %1094 = vmatprep.subr.bf16.mxu1 %v1522_v61 }
  0x6d   :  { %1054 = vmatpush1.bf16.msra.mxu0 %v1517_v62  ;;  %1095 = vmatpush1.bf16.msra.mxu1 %v1520_v63 }
  0x6e   :  { %1055 = vmatprep.subr.bf16.mxu0 %v1525_v0  ;;  %1096 = vmatprep.subr.bf16.mxu1 %v1528_v1  ;;  %v1573_v0 = vld [vmem:[#allocation4 + $0x8] ss:$12 sps:$4 sm:$0xff]  }
  0x6f   :  { %v1574_v1 = vld [vmem:[#allocation4 + $0x188] ss:$12 sps:$4 sm:$0xff]  }
  0x71   :  { %1056 = vmatpush1.bf16.msra.mxu0 %v1523_v2  ;;  %1097 = vmatpush1.bf16.msra.mxu1 %v1526_v3  ;;  %v1575_v3 = vld [vmem:[#allocation4 + $0xe0] ss:$12 sps:$4 sm:$0xff]  }
  0x72   :  { %1057 = vmatprep.subr.bf16.mxu0 %v1531_v4  ;;  %1098 = vmatprep.subr.bf16.mxu1 %v1534_v5  ;;  %v1576_v4 = vld [vmem:[#allocation4 + $0x260] ss:$12 sps:$4 sm:$0xff]  }
  0x73   :  { %v1577_v5 = vld [vmem:[#allocation4 + $0x20] ss:$12 sps:$4 sm:$0xff]  }
  0x75   :  { %1058 = vmatpush1.bf16.msra.mxu0 %v1529_v6  ;;  %1099 = vmatpush1.bf16.msra.mxu1 %v1532_v7  ;;  %v1578_v6 = vld [vmem:[#allocation4 + $0x1a0] ss:$12 sps:$4 sm:$0xff]   ;;  %v1579_v7 = vld [vmem:[#allocation4 + $0xf8] ss:$12 sps:$4 sm:$0xff]  }
  0x76   :  { %1059 = vmatprep.subr.bf16.mxu0 %v1537_v8  ;;  %1100 = vmatprep.subr.bf16.mxu1 %v1540_v9  ;;  %v1580_v8 = vld [vmem:[#allocation4 + $0x278] ss:$12 sps:$4 sm:$0xff]  }
  0x79   :  { %1060 = vmatpush1.bf16.msra.mxu0 %v1535_v10  ;;  %1101 = vmatpush1.bf16.msra.mxu1 %v1538_v11 }
  0x7a   :  { %1061 = vmatprep.subr.bf16.mxu0 %v1543_v12  ;;  %1102 = vmatprep.subr.bf16.mxu1 %v1546_v13  ;;  %v1581_v13 = vld [vmem:[#allocation4 + $0x38] ss:$12 sps:$4 sm:$0xff]  }
  0x7d   :  { %1062 = vmatpush1.bf16.msra.mxu0 %v1541_v14  ;;  %1103 = vmatpush1.bf16.msra.mxu1 %v1544_v15  ;;  %v1582_v14 = vld [vmem:[#allocation4 + $0x1b8] ss:$12 sps:$4 sm:$0xff]  }
  0x7e   :  { %1063 = vmatprep.subr.bf16.mxu0 %v1549_v16  ;;  %1104 = vmatprep.subr.bf16.mxu1 %v1552_v17  ;;  %v1583_v17 = vld [vmem:[#allocation4 + $0x110] ss:$12 sps:$4 sm:$0xff]  }
  0x81   :  { %1064 = vmatpush1.bf16.msra.mxu0 %v1547_v18  ;;  %1105 = vmatpush1.bf16.msra.mxu1 %v1550_v19  ;;  %v1584_v18 = vld [vmem:[#allocation4 + $0x290] ss:$12 sps:$4 sm:$0xff]  }
  0x82   :  { %1065 = vmatprep.subr.bf16.mxu0 %v1555_v20  ;;  %1106 = vmatprep.subr.bf16.mxu1 %v1558_v21  ;;  %v1585_v21 = vld [vmem:[#allocation4 + $0x50] ss:$12 sps:$4 sm:$0xff]  }
  0x85   :  { %1066 = vmatpush1.bf16.msra.mxu0 %v1553_v22  ;;  %1107 = vmatpush1.bf16.msra.mxu1 %v1556_v23  ;;  %v1586_v22 = vld [vmem:[#allocation4 + $0x1d0] ss:$12 sps:$4 sm:$0xff]   ;;  %v1587_v23 = vld [vmem:[#allocation4 + $0x128] ss:$12 sps:$4 sm:$0xff]  }
  0x86   :  { %1067 = vmatprep.subr.bf16.mxu0 %v1561_v24  ;;  %1108 = vmatprep.subr.bf16.mxu1 %v1564_v25  ;;  %v1588_v24 = vld [vmem:[#allocation4 + $0x2a8] ss:$12 sps:$4 sm:$0xff]  }
  0x87   :  { %v1589_v25 = vld [vmem:[#allocation4 + $0x68] ss:$12 sps:$4 sm:$0xff]  }
  0x89   :  { %1068 = vmatpush1.bf16.msra.mxu0 %v1559_v26  ;;  %1109 = vmatpush1.bf16.msra.mxu1 %v1562_v27  ;;  %v1590_v26 = vld [vmem:[#allocation4 + $0x1e8] ss:$12 sps:$4 sm:$0xff]   ;;  %v1591_v27 = vld [vmem:[#allocation4 + $0x140] ss:$12 sps:$4 sm:$0xff]  }
  0x8a   :  { %1069 = vmatprep.subr.bf16.mxu0 %v1567_v28  ;;  %1110 = vmatprep.subr.bf16.mxu1 %v1570_v29  ;;  %v1592_v28 = vld [vmem:[#allocation4 + $0x2c0] ss:$12 sps:$4 sm:$0xff]  }
  0x8b   :  { %v1593_v29 = vld [vmem:[#allocation4 + $0x80] ss:$12 sps:$4 sm:$0xff]  }
  0x8d   :  { %1070 = vmatpush1.bf16.msra.mxu0 %v1565_v30  ;;  %1111 = vmatpush1.bf16.msra.mxu1 %v1568_v31  ;;  %v1594_v30 = vld [vmem:[#allocation4 + $0x200] ss:$12 sps:$4 sm:$0xff]   ;;  %v1595_v31 = vld [vmem:[#allocation4 + $0x158] ss:$12 sps:$4 sm:$0xff]  }
  0x8e   :  { %1384 = vmatprep.subr.bf16.mxu0 %v1571_v32  ;;  %1406 = vmatprep.subr.bf16.mxu1 %v1572_v33  ;;  %v1596_v32 = vld [vmem:[#allocation4 + $0x2d8] ss:$12 sps:$4 sm:$0xff]  }
  0x8f   :  { %v1597_v33 = vld [vmem:[#allocation4 + $0x98] ss:$12 sps:$4 sm:$0xff]  }
 0x117   :  { %v203_v45 = vpop.f32.mrb[0].mxu0  ;;  %v244_v46 = vpop.f32.mrb[0].mxu1 }
 0x118   :  { %v204_v47 = vadd.f32 %v203_v45, %v85_v41  ;;  %v245_v48 = vadd.f32 %v244_v46, %v93_v42  ;;  %v205_v49 = vpop.f32.mrb[1].mxu0  ;;  %v246_v50 = vpop.f32.mrb[1].mxu1  ;;  %v1602_v41 = vld [vmem:[#allocation4 + $0x230] ss:$12 sps:$4 sm:$0xff]  }
 0x119   :  { %v206_v51 = vadd.f32 %v205_v49, %v89_v43  ;;  %v247_v52 = vadd.f32 %v246_v50, %v97_v44  ;;  %v207_v53 = vpop.f32.mrb[2].mxu0  ;;  %v248_v54 = vpop.f32.mrb[2].mxu1  ;;  %v1201_v42 = vld [vmem:[%s1826_s6] sm:$0x7] }
 0x11a   :  { %v251_v55 = vmax.f32 %v204_v47, 0.0  ;;  %v253_v56 = vmax.f32 %v245_v48, 0.0  ;;  %v208_v57 = vpop.f32.mrb[3].mxu0  ;;  %v249_v58 = vpop.f32.mrb[3].mxu1  ;;  %v1206_v46 = vrot.slane %v1201_v42, %v1779_v36  ;;  %v1210_v50 = vrot.slane %v1201_v42, %v1786_v39  ;;  %v1224_v53 = vld [vmem:[%s1824_s4] sm:$0x7] }
 0x11b   :  { %v252_v59 = vmax.f32 %v206_v51, 0.0  ;;  %v254_v60 = vmax.f32 %v247_v52, 0.0 }
 0x11c   :  { %v1791_v61 = vpack.c.bf16 %v253_v56, %v253_v56  ;;  %v1793_v2 = vpack.c.bf16 %v251_v55, %v251_v55 }
 0x11d   :  { %v256_v62 = vpack.c.bf16 %v252_v59, %v252_v59  ;;  %v258_v63 = vpack.c.bf16 %v254_v60, %v254_v60  ;;  %v1229_v59 = vrot.slane %v1224_v53, %v1779_v36 }
 0x11f   :  { %1071 = vmatprep.mubr.bf16.mxu0 %v256_v62  ;;  %1112 = vmatprep.mubr.bf16.mxu1 %v258_v63 }
 0x120   :  { %1072 = vmatmul.mubr.bf16.vlgmr.msra.gmra.mrb[8].mxu0 %v1793_v2  ;;  %1113 = vmatmul.mubr.bf16.vlgmr.msra.gmra.mrb[8].mxu1 %v1791_v61 }
 0x121   :  { %1385 = vmatpush3.bf16.msra.mxu0 %v1573_v0  ;;  %1407 = vmatpush3.bf16.msra.mxu1 %v1574_v1 }
 0x122   :  { %1153 = vmatprep.mubr.bf16.mxu0 %v256_v62  ;;  %1193 = vmatprep.mubr.bf16.mxu1 %v258_v63 }
 0x123   :  { %1386 = vmatprep.subr.bf16.mxu0 %v1575_v3  ;;  %1408 = vmatprep.subr.bf16.mxu1 %v1576_v4  ;;  %v480_v9 = vpop.f32.mrb[4].mxu0  ;;  %v1797_v10 = vpop.f32.mrb[4].mxu1 }
 0x124   :  { %v1799_v11 = vpop.f32.mrb[5].mxu0  ;;  %v1436_v12 = vpop.f32.mrb[5].mxu1 }
 0x125   :  { %1387 = vmatpush3.bf16.msra.mxu0 %v1577_v5  ;;  %1409 = vmatpush3.bf16.msra.mxu1 %v1578_v6  ;;  %v484_v15 = vpop.f32.mrb[6].mxu0  ;;  %v524_v16 = vpop.f32.mrb[6].mxu1 }
 0x126   :  { %1388 = vmatprep.subr.bf16.mxu0 %v1579_v7  ;;  %1410 = vmatprep.subr.bf16.mxu1 %v1580_v8  ;;  %v485_v19 = vpop.f32.mrb[7].mxu0  ;;  %v1437_v20 = vpop.f32.mrb[7].mxu1  ;;  %v1237_v16 = vrot.slane %v1224_v53, %v1781_v37 }
 0x129   :  { %1389 = vmatpush3.bf16.msra.mxu0 %v1581_v13  ;;  %1411 = vmatpush3.bf16.msra.mxu1 %v1582_v14  ;;  %v1214_v14 = vrot.slane %v1201_v42, %v1781_v37 }
 0x12a   :  { %1390 = vmatprep.subr.bf16.mxu0 %v1583_v17  ;;  %1412 = vmatprep.subr.bf16.mxu1 %v1584_v18 }
 0x12d   :  { %1391 = vmatpush3.bf16.msra.mxu0 %v1585_v21  ;;  %1413 = vmatpush3.bf16.msra.mxu1 %v1586_v22 }
 0x12e   :  { %1392 = vmatprep.subr.bf16.mxu0 %v1587_v23  ;;  %1414 = vmatprep.subr.bf16.mxu1 %v1588_v24 }
 0x131   :  { %1393 = vmatpush3.bf16.msra.mxu0 %v1589_v25  ;;  %1415 = vmatpush3.bf16.msra.mxu1 %v1590_v26 }
 0x132   :  { %1394 = vmatprep.subr.bf16.mxu0 %v1591_v27  ;;  %1416 = vmatprep.subr.bf16.mxu1 %v1592_v28 }
 0x135   :  { %1395 = vmatpush3.bf16.msra.mxu0 %v1593_v29  ;;  %1417 = vmatpush3.bf16.msra.mxu1 %v1594_v30 }
 0x136   :  { %1396 = vmatprep.subr.bf16.mxu0 %v1595_v31  ;;  %1418 = vmatprep.subr.bf16.mxu1 %v1596_v32 }
 0x139   :  { %1397 = vmatpush3.bf16.msra.mxu0 %v1597_v33  ;;  %1419 = vmatpush3.bf16.msra.mxu1 %v1598_v34 }
 0x13a   :  { %1398 = vmatprep.subr.bf16.mxu0 %v1599_v35  ;;  %1420 = vmatprep.subr.bf16.mxu1 %v1600_v38 }
 0x13d   :  { %1399 = vmatpush3.bf16.msra.mxu0 %v1601_v40  ;;  %1421 = vmatpush3.bf16.msra.mxu1 %v1602_v41 }
 0x140   :  { %1154 = vmatmul.mubr.bf16.vlgmr.msra.gmra.mrb[12].mxu0 %v1793_v2  ;;  %1194 = vmatmul.mubr.bf16.vlgmr.msra.gmra.mrb[12].mxu1 %v1791_v61  ;;  %v1233_v61 = vrot.slane %v1224_v53, %v1786_v39 }
 0x1f3   :  { %v1073_v43 = vpop.f32.mrb[8].mxu0  ;;  %v1114_v44 = vpop.f32.mrb[8].mxu1 }
 0x1f4   :  { %v1074_v45 = vadd.f32 %v1073_v43, %v480_v9  ;;  %v1075_v47 = vpop.f32.mrb[9].mxu0  ;;  %v1116_v48 = vpop.f32.mrb[9].mxu1 }
 0x1f5   :  { %v1076_v49 = vadd.f32 %v1075_v47, %v1799_v11  ;;  %v1077_v51 = vpop.f32.mrb[10].mxu0  ;;  %v1118_v52 = vpop.f32.mrb[10].mxu1 }
 0x1f6   :  { %v1115_v54 = vadd.f32 %v1114_v44, %v1074_v45  ;;  %v1078_v55 = vpop.f32.mrb[11].mxu0  ;;  %v1119_v56 = vpop.f32.mrb[11].mxu1 }
 0x1f7   :  { %v1117_v57 = vadd.f32 %v1116_v48, %v1076_v49 }
 0x1f8   :  { %v1218_v58 = vadd.f32 %v1206_v46, %v1115_v54 }
 0x1f9   :  { %v1219_v60 = vadd.f32 %v1210_v50, %v1117_v57 }
 0x1fa   :  { %v1221_v62 = vmax.f32 %v1218_v58, 0.0 }
 0x1fb   :  { %v1222_v63 = vmax.f32 %v1219_v60, 0.0 }
 0x1fc   :  { %v1241_v0 = vmul.f32 %v1229_v59, %v1221_v62 }
 0x1fd   :  { %v1242_v1 = vmul.f32 %v1233_v61, %v1222_v63 }
 0x1ff   :  { %v1244_v2 = vadd.f32 %v1242_v1, %v1241_v0 }
 0x213   :  { %v1400_v3 = vpop.f32.mrb[12].mxu0  ;;  %v1422_v4 = vpop.f32.mrb[12].mxu1 }
 0x214   :  { %v1401_v5 = vpop.f32.mrb[13].mxu0  ;;  %v1423_v6 = vpop.f32.mrb[13].mxu1 }
 0x215   :  { %v1402_v7 = vadd.f32 %v1401_v5, %v1400_v3  ;;  %v1424_v8 = vadd.f32 %v1423_v6, %v1422_v4  ;;  %v1403_v9 = vpop.f32.mrb[14].mxu0  ;;  %v1425_v11 = vpop.f32.mrb[14].mxu1 }
 0x216   :  { %v1404_v12 = vpop.f32.mrb[15].mxu0  ;;  %v1426_v13 = vpop.f32.mrb[15].mxu1 }
 0x217   :  { %v1156_v36 = vadd.f32 %v1402_v7, %v1797_v10 }
 0x219   :  { %v1196_v39 = vadd.f32 %v1424_v8, %v1156_v36 }
 0x21b   :  { %v1220_v15 = vadd.f32 %v1214_v14, %v1196_v39 }
 0x21d   :  { %v1223_v17 = vmax.f32 %v1220_v15, 0.0 }
 0x21f   :  { %v1243_v18 = vmul.f32 %v1237_v16, %v1223_v17 }
 0x221   :  { %v1245_v19 = vadd.f32 %v1244_v2, %v1243_v18 }
 0x223   :  { %1246 = vadd.xlane.f32.xlu0 %v1245_v19 }
 0x2b0   :  { %v1247_v20 = vpop.xlane.xlu0 %1246 }
 0x2b1   :  { %1249 = vst.msk [vmem:[%s1827_s7] sm:$0xff] %vm1248_vm3, %v1247_v20 }
 0x2b2   :  { %1254 = vsyncpa [#allocation3], 1 }
 0x2b3   :  { %1255 = vsyncpa [#allocation5], 1 }

</bundles_post_ra>
